<compile_context>
chip_gen: v7x
topology: tpu7x:2x2x1
jax: 0.10.0
libtpu: 0.0.40
codegen_flags: <defaults>
</compile_context>

<pallas_src>
import jax
import jax.numpy as jnp
from jax import lax
from jax.experimental import pallas as pl
from jax.experimental.pallas import tpu as pltpu


def fcnn_kernel(x_ref, *refs):
    """Fused MLP: (Linear -> ReLU) * (L-1) -> Linear, for one batch tile.

    refs = (w0, b0, w1, b1, ..., w_last_T, b_last, out_ref)
      w_i      : (in_i, out_i)      for hidden layers
      w_last_T : (out_dim, hidden)  (PyTorch layout, used for VPU reduction)
      b_i      : (1, out_i)
      out_ref  : (out_dim, batch_tile)   -- lane-dense (batch on lanes)
    """
    out_ref = refs[-1]
    param_refs = refs[:-1]
    n_layers = len(param_refs) // 2

    h = x_ref[...]  # (TB, in), f32

    # Hidden layers on the MXU, ReLU on the VPU.
    for i in range(n_layers - 1):
        w = param_refs[2 * i][...]        # (in_i, out_i)
        b = param_refs[2 * i + 1][...]    # (1, out_i)
        h = jnp.maximum(
            jnp.dot(h, w, preferred_element_type=jnp.float32) + b, 0.0
        )

    w_last_t = param_refs[-2][...]        # (out_dim, hidden)
    b_last = param_refs[-1][...]          # (1, out_dim)
    out_dim = w_last_t.shape[0]

    if out_dim == 1:
        # N=1 final layer: VPU broadcast-multiply + XLU row reduce; avoids an
        # almost-empty MXU pass and yields a lane-dense (1, TB) slab directly.
        y = jnp.sum(h * w_last_t, axis=-1)[None, :] + b_last  # (1, TB)
        out_ref[...] = y.astype(out_ref.dtype)
    else:
        y = lax.dot_general(
            h, w_last_t, (((1,), (1,)), ((), ())),
            preferred_element_type=jnp.float32,
        ) + b_last                                            # (TB, out_dim)
        out_ref[...] = y.T.astype(out_ref.dtype)              # (out_dim, TB)


def _pick_batch_tile(batch):
    """Single tile on v5e/v6e (one TensorCore); on v7x split across the 2 TCs
    only if each tile stays a multiple of 128 lanes (keeps stores lane-dense)."""
    n_tc = 1
    try:
        kind = (jax.devices()[0].device_kind or "").lower()
        if "v7" in kind:
            n_tc = 2
    except Exception:
        pass
    if n_tc > 1 and batch % n_tc == 0 and (batch // n_tc) % 128 == 0:
        return batch // n_tc
    return batch


def fcnn_forward(x, params, *, batch_tile=None):
    """x: (B, input_size) float32. params: list of (W, b) with W:(in,out), b:(1,out)."""
    B, in_dim = x.shape
    out_dim = params[-1][0].shape[1]

    if batch_tile is None:
        batch_tile = _pick_batch_tile(B)
    assert B % batch_tile == 0, "batch must be a multiple of batch_tile"
    grid = (B // batch_tile,)

    # Flatten params: w0, b0, w1, b1, ..., w_last (transposed to (out, in)), b_last.
    flat_params = []
    for li, (w, b) in enumerate(params):
        if li == len(params) - 1:
            flat_params.append(w.T)   # (out_dim, hidden) for the VPU-reduction path
        else:
            flat_params.append(w)
        flat_params.append(b)

    in_specs = [pl.BlockSpec((batch_tile, in_dim), lambda i: (i, 0))]
    for p in flat_params:
        # Whole (tiny) parameter tensor resident for every batch tile.
        in_specs.append(pl.BlockSpec(p.shape, lambda i: (0, 0)))

    # Lane-dense output: (out_dim, B), batch on lanes. Transposed back outside.
    out_spec = pl.BlockSpec((out_dim, batch_tile), lambda i: (0, i))

    out_t = pl.pallas_call(
        fcnn_kernel,
        out_shape=jax.ShapeDtypeStruct((out_dim, B), x.dtype),
        grid=grid,
        in_specs=in_specs,
        out_specs=out_spec,
        compiler_params=pltpu.CompilerParams(
            dimension_semantics=("parallel",),
        ),
    )(x, *flat_params)

    return out_t.T  # (B, out_dim), matching the PyTorch forward


def init_fcnn_params(key, input_size, hidden_size, output_size, num_layers):
    """Deterministic synthetic init matching FCNN.__init__ layer shapes."""
    dims = [input_size] + [hidden_size] * (num_layers - 1) + [output_size]
    params = []
    for i in range(num_layers):
        key, kw, kb = jax.random.split(key, 3)
        fan_in = dims[i]
        bound = 1.0 / jnp.sqrt(jnp.float32(fan_in))
        w = jax.random.uniform(kw, (dims[i], dims[i + 1]), jnp.float32, -bound, bound)
        b = jax.random.uniform(kb, (1, dims[i + 1]), jnp.float32, -bound, bound)
        params.append((w, b))
    return params


def fcnn_reference(x, params):
    h = x
    for i, (w, b) in enumerate(params):
        h = h @ w + b
        if i < len(params) - 1:
            h = jnp.maximum(h, 0.0)
    return h


if __name__ == "__main__":
    # FCNN(input_size=3, hidden_size=32, output_size=1, num_layers=4)
    input_size, hidden_size, output_size, num_layers = 3, 32, 1, 4
    batch = 128

    key = jax.random.PRNGKey(0)
    key, kx = jax.random.split(key)
    x = jax.random.normal(kx, (batch, input_size), dtype=jnp.float32)

    params = init_fcnn_params(key, input_size, hidden_size, output_size, num_layers)

    out = fcnn_forward(x, params)
    out = jax.block_until_ready(out)

    ref = fcnn_reference(x, params)
    assert out.shape == (batch, output_size)
    assert jnp.allclose(out, ref, atol=1e-5, rtol=1e-5), "mismatch vs reference"

    print("KERNEL_OK")
</pallas_src>

<mosaic_0001>
module attributes {stable_mosaic.version = 11 : i64} {
  func.func @fcnn_kernel(%arg0: i32, %arg1: memref<128x3xf32, #tpu.memory_space<vmem>>, %arg2: memref<3x32xf32, #tpu.memory_space<vmem>>, %arg3: memref<1x32xf32, #tpu.memory_space<vmem>>, %arg4: memref<32x32xf32, #tpu.memory_space<vmem>>, %arg5: memref<1x32xf32, #tpu.memory_space<vmem>>, %arg6: memref<32x32xf32, #tpu.memory_space<vmem>>, %arg7: memref<1x32xf32, #tpu.memory_space<vmem>>, %arg8: memref<1x32xf32, #tpu.memory_space<vmem>>, %arg9: memref<1x1xf32, #tpu.memory_space<vmem>>, %arg10: memref<1x128xf32, #tpu.memory_space<vmem>>) attributes {dimension_semantics = [#tpu.dimension_semantics<parallel>], iteration_bounds = array<i64: 1>, scalar_prefetch = 0 : i64, scratch_operands = 0 : i64, tpu.core_type = #tpu.core_type<tc>, window_params = [{transform_indices = @transform_0, window_bounds = array<i64: 128, 3>}, {pipeline_mode = #tpu.pipeline_mode<synchronous>, transform_indices = @transform_1, window_bounds = array<i64: 3, 32>}, {pipeline_mode = #tpu.pipeline_mode<synchronous>, transform_indices = @transform_2, window_bounds = array<i64: 1, 32>}, {pipeline_mode = #tpu.pipeline_mode<synchronous>, transform_indices = @transform_3, window_bounds = array<i64: 32, 32>}, {pipeline_mode = #tpu.pipeline_mode<synchronous>, transform_indices = @transform_4, window_bounds = array<i64: 1, 32>}, {pipeline_mode = #tpu.pipeline_mode<synchronous>, transform_indices = @transform_5, window_bounds = array<i64: 32, 32>}, {pipeline_mode = #tpu.pipeline_mode<synchronous>, transform_indices = @transform_6, window_bounds = array<i64: 1, 32>}, {pipeline_mode = #tpu.pipeline_mode<synchronous>, transform_indices = @transform_7, window_bounds = array<i64: 1, 32>}, {pipeline_mode = #tpu.pipeline_mode<synchronous>, transform_indices = @transform_8, window_bounds = array<i64: 1, 1>}, {transform_indices = @transform_9, window_bounds = array<i64: 1, 128>}]} {
    %c0 = arith.constant 0 : index
    %c0_0 = arith.constant 0 : index
    %0 = vector.load %arg1[%c0, %c0_0] : memref<128x3xf32, #tpu.memory_space<vmem>>, vector<128x3xf32>
    %c0_1 = arith.constant 0 : index
    %c0_2 = arith.constant 0 : index
    %1 = vector.load %arg2[%c0_1, %c0_2] : memref<3x32xf32, #tpu.memory_space<vmem>>, vector<3x32xf32>
    %c0_3 = arith.constant 0 : index
    %c0_4 = arith.constant 0 : index
    %2 = vector.load %arg3[%c0_3, %c0_4] : memref<1x32xf32, #tpu.memory_space<vmem>>, vector<1x32xf32>
    %cst = arith.constant dense<0.000000e+00> : vector<128x32xf32>
    %3 = tpu.matmul %0, %1, %cst {dimension_numbers = #tpu.dot_dimension_numbers<[1], [0], [0], [1], [0, 0, 1, 1], [], []>} : vector<128x3xf32>, vector<3x32xf32>, vector<128x32xf32> -> vector<128x32xf32>
    %4 = vector.broadcast %2 : vector<1x32xf32> to vector<128x32xf32>
    %5 = arith.addf %3, %4 : vector<128x32xf32>
    %cst_5 = arith.constant 0.000000e+00 : f32
    %6 = vector.broadcast %cst_5 : f32 to vector<128x32xf32>
    %7 = arith.maximumf %5, %6 : vector<128x32xf32>
    %c0_6 = arith.constant 0 : index
    %c0_7 = arith.constant 0 : index
    %8 = vector.load %arg4[%c0_6, %c0_7] : memref<32x32xf32, #tpu.memory_space<vmem>>, vector<32x32xf32>
    %c0_8 = arith.constant 0 : index
    %c0_9 = arith.constant 0 : index
    %9 = vector.load %arg5[%c0_8, %c0_9] : memref<1x32xf32, #tpu.memory_space<vmem>>, vector<1x32xf32>
    %cst_10 = arith.constant dense<0.000000e+00> : vector<128x32xf32>
    %10 = tpu.matmul %7, %8, %cst_10 {dimension_numbers = #tpu.dot_dimension_numbers<[1], [0], [0], [1], [0, 0, 1, 1], [], []>} : vector<128x32xf32>, vector<32x32xf32>, vector<128x32xf32> -> vector<128x32xf32>
    %11 = vector.broadcast %9 : vector<1x32xf32> to vector<128x32xf32>
    %12 = arith.addf %10, %11 : vector<128x32xf32>
    %cst_11 = arith.constant 0.000000e+00 : f32
    %13 = vector.broadcast %cst_11 : f32 to vector<128x32xf32>
    %14 = arith.maximumf %12, %13 : vector<128x32xf32>
    %c0_12 = arith.constant 0 : index
    %c0_13 = arith.constant 0 : index
    %15 = vector.load %arg6[%c0_12, %c0_13] : memref<32x32xf32, #tpu.memory_space<vmem>>, vector<32x32xf32>
    %c0_14 = arith.constant 0 : index
    %c0_15 = arith.constant 0 : index
    %16 = vector.load %arg7[%c0_14, %c0_15] : memref<1x32xf32, #tpu.memory_space<vmem>>, vector<1x32xf32>
    %cst_16 = arith.constant dense<0.000000e+00> : vector<128x32xf32>
    %17 = tpu.matmul %14, %15, %cst_16 {dimension_numbers = #tpu.dot_dimension_numbers<[1], [0], [0], [1], [0, 0, 1, 1], [], []>} : vector<128x32xf32>, vector<32x32xf32>, vector<128x32xf32> -> vector<128x32xf32>
    %18 = vector.broadcast %16 : vector<1x32xf32> to vector<128x32xf32>
    %19 = arith.addf %17, %18 : vector<128x32xf32>
    %cst_17 = arith.constant 0.000000e+00 : f32
    %20 = vector.broadcast %cst_17 : f32 to vector<128x32xf32>
    %21 = arith.maximumf %19, %20 : vector<128x32xf32>
    %c0_18 = arith.constant 0 : index
    %c0_19 = arith.constant 0 : index
    %22 = vector.load %arg8[%c0_18, %c0_19] : memref<1x32xf32, #tpu.memory_space<vmem>>, vector<1x32xf32>
    %c0_20 = arith.constant 0 : index
    %c0_21 = arith.constant 0 : index
    %23 = vector.load %arg9[%c0_20, %c0_21] : memref<1x1xf32, #tpu.memory_space<vmem>>, vector<1x1xf32>
    %24 = vector.broadcast %22 : vector<1x32xf32> to vector<128x32xf32>
    %25 = arith.mulf %21, %24 : vector<128x32xf32>
    %cst_22 = arith.constant dense<0.000000e+00> : vector<128xf32>
    %26 = vector.multi_reduction <add>, %25, %cst_22 [1] : vector<128x32xf32> to vector<128xf32>
    %27 = vector.shape_cast %26 : vector<128xf32> to vector<1x128xf32>
    %28 = vector.broadcast %23 : vector<1x1xf32> to vector<1x128xf32>
    %29 = arith.addf %27, %28 : vector<1x128xf32>
    %c0_23 = arith.constant 0 : index
    %c0_24 = arith.constant 0 : index
    %30 = vector.load %arg10[%c0_23, %c0_24] : memref<1x128xf32, #tpu.memory_space<vmem>>, vector<1x128xf32>
    tpu.vector_store %arg10[%c0_23, %c0_24], %29 {strides = array<i32>} : memref<1x128xf32, #tpu.memory_space<vmem>>, vector<1x128xf32>,
    return
  }
  func.func @transform_0(%arg0: i32) -> (i32, i32) {
    %c0_i32 = arith.constant 0 : i32
    %c0_i32_0 = arith.constant 0 : i32
    return %arg0, %c0_i32 : i32, i32
  }
  func.func @transform_1(%arg0: i32) -> (i32, i32) {
    %c0_i32 = arith.constant 0 : i32
    %c0_i32_0 = arith.constant 0 : i32
    %c0_i32_1 = arith.constant 0 : i32
    return %c0_i32, %c0_i32_0 : i32, i32
  }
  func.func @transform_2(%arg0: i32) -> (i32, i32) {
    %c0_i32 = arith.constant 0 : i32
    %c0_i32_0 = arith.constant 0 : i32
    %c0_i32_1 = arith.constant 0 : i32
    return %c0_i32, %c0_i32_0 : i32, i32
  }
  func.func @transform_3(%arg0: i32) -> (i32, i32) {
    %c0_i32 = arith.constant 0 : i32
    %c0_i32_0 = arith.constant 0 : i32
    %c0_i32_1 = arith.constant 0 : i32
    return %c0_i32, %c0_i32_0 : i32, i32
  }
  func.func @transform_4(%arg0: i32) -> (i32, i32) {
    %c0_i32 = arith.constant 0 : i32
    %c0_i32_0 = arith.constant 0 : i32
    %c0_i32_1 = arith.constant 0 : i32
    return %c0_i32, %c0_i32_0 : i32, i32
  }
  func.func @transform_5(%arg0: i32) -> (i32, i32) {
    %c0_i32 = arith.constant 0 : i32
    %c0_i32_0 = arith.constant 0 : i32
    %c0_i32_1 = arith.constant 0 : i32
    return %c0_i32, %c0_i32_0 : i32, i32
  }
  func.func @transform_6(%arg0: i32) -> (i32, i32) {
    %c0_i32 = arith.constant 0 : i32
    %c0_i32_0 = arith.constant 0 : i32
    %c0_i32_1 = arith.constant 0 : i32
    return %c0_i32, %c0_i32_0 : i32, i32
  }
  func.func @transform_7(%arg0: i32) -> (i32, i32) {
    %c0_i32 = arith.constant 0 : i32
    %c0_i32_0 = arith.constant 0 : i32
    %c0_i32_1 = arith.constant 0 : i32
    return %c0_i32, %c0_i32_0 : i32, i32
  }
  func.func @transform_8(%arg0: i32) -> (i32, i32) {
    %c0_i32 = arith.constant 0 : i32
    %c0_i32_0 = arith.constant 0 : i32
    %c0_i32_1 = arith.constant 0 : i32
    return %c0_i32, %c0_i32_0 : i32, i32
  }
  func.func @transform_9(%arg0: i32) -> (i32, i32) {
    %c0_i32 = arith.constant 0 : i32
    %c0_i32_0 = arith.constant 0 : i32
    return %c0_i32, %arg0 : i32, i32
  }
}

</mosaic_0001>

<bundles_post_ra>
// kernel: tpu_custom_call.1
= control target key start
LH: loop header
LB: loop body
LE: loop exit
PB: predicated region body
PF: predicated region fallthrough
CT: control target
= control target key end

     0   :  { %s1511_s0 = inlined_call_operand.vmem [shape: f32[128,3], index: 0, kind: input, shape index: {}]   ;;  %s1512_s1 = inlined_call_operand.vmem [shape: f32[3,32], index: 1, kind: input, shape index: {}]   ;;  %s1513_s2 = inlined_call_operand.vmem [shape: f32[1,32], index: 2, kind: input, shape index: {}]   ;;  %s1514_s3 = inlined_call_operand.vmem [shape: f32[32,32], index: 3, kind: input, shape index: {}]   ;;  %s1515_s4 = inlined_call_operand.vmem [shape: f32[1,32], index: 4, kind: input, shape index: {}]   ;;  %s1516_s5 = inlined_call_operand.vmem [shape: f32[32,32], index: 5, kind: input, shape index: {}]   ;;  %s1517_s6 = inlined_call_operand.vmem [shape: f32[1,32], index: 6, kind: input, shape index: {}]   ;;  %s1518_s7 = inlined_call_operand.vmem [shape: f32[1,32], index: 7, kind: input, shape index: {}]   ;;  %s1519_s8 = inlined_call_operand.<no memory space> [shape: f32[1,1], index: 8, kind: input, shape index: {}]   ;;  %s1520_s9 = inlined_call_operand.hbm [shape: f32[1,128], index: 9, kind: output, shape index: {}]  }
   0x1   :  { %v14_v0 = vstv %s1519_s8 }
   0x2   :  { %15 = vst [vmem:[#allocation2] sm:$0x1] %v14_v0 }
   0x3   :  { %v51_v1 = vld [vmem:[%s1512_s1] sm:$0x7]  ;;  %vm108_vm0 = vcmask 1042432   ;;  %vm59_vm1 = vcmask 23552   ;;  %v36_v3 = vld [vmem:[%s1511_s0 + $0x8] sm:$0xff]  ;;  %v37_v4 = vld [vmem:[%s1511_s0 + $0x10] sm:$0xff] }
   0x4   :  { %v35_v2 = vld [vmem:[%s1511_s0] sm:$0xff]  ;;  %1064 = vmatprep.subr.msk.mxu0 %vm108_vm0, %v51_v1  ;;  %1170 = vmatprep.subr.msk.mxu1 %vm108_vm0, %v51_v1  ;;  %v44_v6 = vld [vmem:[%s1511_s0 + $0x48] sm:$0xff]  ;;  %v45_v7 = vld [vmem:[%s1511_s0 + $0x50] sm:$0xff] }
   0x5   :  { %1066 = vmatprep.mubr.msk.f32.mxu0 %vm59_vm1, %v35_v2  ;;  %1065 = vmatpush3.msk.msra.mxu0 %vm108_vm0, %v51_v1  ;;  %v43_v5 = vld [vmem:[%s1511_s0 + $0x40] sm:$0xff]  ;;  %v38_v8 = vld [vmem:[%s1511_s0 + $0x18] sm:$0xff]  ;;  %v274_v12 = vld [vmem:[%s1514_s3 + $0x8] sm:$0xff] }
   0x6   :  { %1067 = vmatmul.mubr.msk.f32.vlgmr.msra.gmra.mrb[0].mxu0 %vm59_vm1, %v36_v3  ;;  %1171 = vmatpush3.msk.msra.mxu1 %vm108_vm0, %v51_v1  ;;  %v39_v9 = vld [vmem:[%s1511_s0 + $0x20] sm:$0xff]  ;;  %v46_v10 = vld [vmem:[%s1511_s0 + $0x58] sm:$0xff]  ;;  %v275_v13 = vld [vmem:[%s1514_s3 + $0x10] sm:$0xff] }
   0x7   :  { %1069 = vmatprep.mubr.msk.f32.mxu0 %vm59_vm1, %v37_v4  ;;  %1078 = vmatprep.mubr.msk.f32.mxu1 %vm59_vm1, %v43_v5  ;;  %v273_v11 = vld [vmem:[%s1514_s3] sm:$0xff]  ;;  %v276_v14 = vld [vmem:[%s1514_s3 + $0x18] sm:$0xff] }
   0x8   :  { %1079 = vmatmul.mubr.msk.f32.vlgmr.msra.gmra.mrb[0].mxu1 %vm59_vm1, %v44_v6  ;;  %v47_v15 = vld [vmem:[%s1511_s0 + $0x60] sm:$0xff]  ;;  %v1154_v16 = vpack.c.bf16 %v274_v12, %v273_v11  ;;  %v1158_v17 = vpack.c.bf16 %v276_v14, %v275_v13 }
   0x9   :  { %1081 = vmatprep.mubr.msk.f32.mxu1 %vm59_vm1, %v45_v7 }
   0xa   :  { %1070 = vmatmul.mubr.msk.f32.gmra.mrb[2].mxu0 %vm59_vm1, %v38_v8 }
   0xb   :  { %16 = vsyncpa [#allocation4], 0  ;;  %1072 = vmatprep.mubr.msk.f32.mxu0 %vm59_vm1, %v39_v9  ;;  %v40_v18 = vld [vmem:[%s1511_s0 + $0x28] sm:$0xff]  ;;  %v41_v19 = vld [vmem:[%s1511_s0 + $0x30] sm:$0xff]  ;;  %1155 = vmatprep.subr.bf16.mxu1 %v1154_v16  ;;  %vm284_vm2 = vcmask 261120   ;;  %vm838_vm3 = vcmask 130112  }
   0xc   :  { %1082 = vmatmul.mubr.msk.f32.gmra.mrb[2].mxu1 %vm59_vm1, %v46_v10  ;;  %v48_v20 = vld [vmem:[%s1511_s0 + $0x68] sm:$0xff]  ;;  %v49_v21 = vld [vmem:[%s1511_s0 + $0x70] sm:$0xff]  ;;  %v42_v22 = vld [vmem:[%s1511_s0 + $0x38] sm:$0xff]  ;;  %vm845_vm4 = vcmask 195712   ;;  %vm852_vm5 = vcmask 261312   ;;  %vm859_vm6 = vcmask 326912  }
   0xd   :  { %1084 = vmatprep.mubr.msk.f32.mxu1 %vm59_vm1, %v47_v15  ;;  %1157 = vmatpush3.bf16.msra.mxu1 %v1154_v16  ;;  %v50_v23 = vld [vmem:[%s1511_s0 + $0x78] sm:$0xff]  ;;  %v494_v24 = vld [vmem:[%s1516_s5] sm:$0xff]  ;;  %v495_v25 = vld [vmem:[%s1516_s5 + $0x8] sm:$0xff]  ;;  %vm866_vm7 = vcmask 392512   ;;  %vm873_vm8 = vcmask 458112   ;;  %vm880_vm9 = vcmask 523712  }
   0xe   :  { %1073 = vmatmul.mubr.msk.f32.gmra.mrb[4].mxu0 %vm59_vm1, %v40_v18  ;;  %1159 = vmatprep.subr.bf16.mxu1 %v1158_v17  ;;  %v496_v26 = vld [vmem:[%s1516_s5 + $0x10] sm:$0xff]  ;;  %v1162_v27 = vpack.c.bf16 %v495_v25, %v494_v24  ;;  %v497_v28 = vld [vmem:[%s1516_s5 + $0x18] sm:$0xff]  ;;  %v954_v30 = vld [vmem:[%s1513_s2] ss:$0 sm:$0xff]  ;;  %vm887_vm10 = vcmask 589312   ;;  %vm894_vm11 = vcmask 654912  }
   0xf   :  { %1075 = vmatprep.mubr.msk.f32.mxu0 %vm59_vm1, %v41_v19  ;;  %v1166_v29 = vpack.c.bf16 %v497_v28, %v496_v26  ;;  %v972_v15 = vld [vmem:[%s1515_s4] ss:$0 sm:$0xff]  ;;  %vm901_vm12 = vcmask 720512   ;;  %vm908_vm13 = vcmask 786112   ;;  %vm915_vm14 = vcmask 851712  }
  0x10   :  { %1085 = vmatmul.mubr.msk.f32.gmra.mrb[4].mxu1 %vm59_vm1, %v48_v20  ;;  %1163 = vmatprep.subr.bf16.mxu0 %v1162_v27  ;;  %vm922_vm15 = vcmask 917312   ;;  %vm929_vm0 = vcmask 982912  }
  0x11   :  { %1087 = vmatprep.mubr.msk.f32.mxu1 %vm59_vm1, %v49_v21  ;;  %1161 = vmatpush3.bf16.msra.mxu1 %v1158_v17 }
  0x12   :  { %1076 = vmatmul.mubr.msk.f32.gmra.mrb[6].mxu0 %vm59_vm1, %v42_v22 }
  0x13   :  { %1165 = vmatpush3.bf16.msra.mxu0 %v1162_v27 }
  0x14   :  { %1088 = vmatmul.mubr.msk.f32.gmra.mrb[6].mxu1 %vm59_vm1, %v50_v23  ;;  %1167 = vmatprep.subr.bf16.mxu0 %v1166_v29  ;;  %vm936_vm1 = vcmask 1048512  }
  0x17   :  { %1169 = vmatpush3.bf16.msra.mxu0 %v1166_v29 }
  0xd9   :  { %v1068_v31 = vpop.f32.mrb[0].mxu0 }
  0xda   :  { %v184_v32 = vadd.f32 %v1068_v31, %v954_v30  ;;  %v178_v33 = vpop.f32.mrb[1].mxu0 }
  0xdb   :  { %v179_v34 = vadd.f32 %v954_v30, %v178_v33  ;;  %v1080_v35 = vpop.f32.mrb[0].mxu1 }
  0xdc   :  { %v218_v36 = vpop.f32.mrb[1].mxu1  ;;  %v258_v39 = vmax.f32 %v184_v32, 0.0  ;;  %v224_v62 = vadd.f32 %v1080_v35, %v954_v30 }
  0xdd   :  { %v257_v37 = vmax.f32 %v179_v34, 0.0  ;;  %v1071_v38 = vpop.f32.mrb[2].mxu0  ;;  %v219_v56 = vadd.f32 %v954_v30, %v218_v36 }
  0xde   :  { %v194_v40 = vadd.f32 %v1071_v38, %v954_v30  ;;  %v188_v41 = vpop.f32.mrb[3].mxu0  ;;  %v266_v3 = vmax.f32 %v224_v62, 0.0 }
  0xdf   :  { %v189_v42 = vadd.f32 %v954_v30, %v188_v41  ;;  %1098 = vmatprep.mubr.msk.f32.mxu1 %vm284_vm2, %v257_v37  ;;  %v1083_v43 = vpop.f32.mrb[2].mxu1  ;;  %v265_v1 = vmax.f32 %v219_v56, 0.0 }
  0xe0   :  { %1099 = vmatmul.mubr.msk.f32.vlgmr.msra.gmra.mrb[8].mxu1 %vm284_vm2, %v258_v39  ;;  %v228_v44 = vpop.f32.mrb[3].mxu1  ;;  %v260_v47 = vmax.f32 %v194_v40, 0.0  ;;  %v234_v4 = vadd.f32 %v1083_v43, %v954_v30 }
  0xe1   :  { %v259_v45 = vmax.f32 %v189_v42, 0.0  ;;  %v1074_v46 = vpop.f32.mrb[4].mxu0  ;;  %v229_v2 = vadd.f32 %v954_v30, %v228_v44 }
  0xe2   :  { %v204_v48 = vadd.f32 %v1074_v46, %v954_v30  ;;  %v198_v49 = vpop.f32.mrb[5].mxu0  ;;  %v268_v7 = vmax.f32 %v234_v4, 0.0 }
  0xe3   :  { %v199_v50 = vadd.f32 %v954_v30, %v198_v49  ;;  %1101 = vmatprep.mubr.msk.f32.mxu1 %vm284_vm2, %v259_v45  ;;  %v1086_v51 = vpop.f32.mrb[4].mxu1  ;;  %v267_v5 = vmax.f32 %v229_v2, 0.0 }
  0xe4   :  { %v262_v52 = vmax.f32 %v204_v48, 0.0  ;;  %1102 = vmatmul.mubr.msk.f32.gmra.mrb[10].mxu1 %vm284_vm2, %v260_v47  ;;  %v238_v53 = vpop.f32.mrb[5].mxu1  ;;  %v244_v8 = vadd.f32 %v1086_v51, %v954_v30 }
  0xe5   :  { %v261_v54 = vmax.f32 %v199_v50, 0.0  ;;  %v1077_v55 = vpop.f32.mrb[6].mxu0  ;;  %v239_v6 = vadd.f32 %v954_v30, %v238_v53 }
  0xe6   :  { %v214_v57 = vadd.f32 %v1077_v55, %v954_v30  ;;  %v208_v58 = vpop.f32.mrb[7].mxu0  ;;  %v270_v11 = vmax.f32 %v244_v8, 0.0 }
  0xe7   :  { %v209_v59 = vadd.f32 %v954_v30, %v208_v58  ;;  %1104 = vmatprep.mubr.msk.f32.mxu1 %vm284_vm2, %v261_v54  ;;  %v1089_v60 = vpop.f32.mrb[6].mxu1  ;;  %v269_v9 = vmax.f32 %v239_v6, 0.0  ;;  %v1394_v6 = vld [vmem:[%s1518_s7] ss:$0 sm:$0xff] }
  0xe8   :  { %v264_v61 = vmax.f32 %v214_v57, 0.0  ;;  %1105 = vmatmul.mubr.msk.f32.gmra.mrb[12].mxu1 %vm284_vm2, %v262_v52  ;;  %v248_v63 = vpop.f32.mrb[7].mxu1  ;;  %v254_v12 = vadd.f32 %v1089_v60, %v954_v30 }
  0xe9   :  { %v263_v0 = vmax.f32 %v209_v59, 0.0  ;;  %v249_v10 = vadd.f32 %v954_v30, %v248_v63 }
  0xea   :  { %v272_v14 = vmax.f32 %v254_v12, 0.0 }
  0xeb   :  { %1107 = vmatprep.mubr.msk.f32.mxu1 %vm284_vm2, %v263_v0  ;;  %v271_v13 = vmax.f32 %v249_v10, 0.0  ;;  %v1200_v0 = vmov 0  }
  0xec   :  { %1108 = vmatmul.mubr.msk.f32.gmra.mrb[14].mxu1 %vm284_vm2, %v264_v61  ;;  %1174 = vset.pattern.permute.xlu1 %v1200_v0 }
  0xed   :  { %1110 = vmatprep.mubr.msk.f32.mxu1 %vm284_vm2, %v265_v1  ;;  %1175 = vset.pattern.permute.xlu0 %v1200_v0  ;;  %v1387_v1 = vld [vmem:[%s1517_s6] ss:$0 sm:$0xff]  ;;  %s1201_s6 = smov [#allocation3]  }
  0xee   :  { %s946_s7 = sshll.u32 %s1201_s6, 4  ;;  %s947_s7 = int_to_ptr.vmem [resolvable:$true] %s946_s7 }
  0xef   :  { %s1176_s8 = scalar_lea.vmem %s947_s7, 16  ;;  %s1180_s1 = scalar_lea.vmem %s947_s7, 32 }
  0xf0   :  { %1111 = vmatmul.mubr.msk.f32.gmra.mrb[16].mxu1 %vm284_vm2, %v266_v3  ;;  %p1177_p0 = scmp.ne.s32.totalorder %s947_s7, %s1176_s8  ;;  %p1181_p1 = scmp.lt.s32.totalorder %s947_s7, %s947_s7 }
  0xf1   :  { %1113 = vmatprep.mubr.msk.f32.mxu1 %vm284_vm2, %v267_v5  ;;  %p1182_p2 = scmp.lt.s32.totalorder %s1180_s1, %s1176_s8 }
  0xf3   :  { %p1183_p3 = por %p1182_p2, %p1181_p1 }
  0xf4   :  { %1114 = vmatmul.mubr.msk.f32.gmra.mrb[18].mxu1 %vm284_vm2, %v268_v7 }
  0xf5   :  { %1116 = vmatprep.mubr.msk.f32.mxu1 %vm284_vm2, %v269_v9  ;;  %p1184_p4 = pnand %p1183_p3, %p1177_p0 }
  0xf8   :  { %1117 = vmatmul.mubr.msk.f32.gmra.mrb[20].mxu1 %vm284_vm2, %v270_v11 }
  0xf9   :  { %1119 = vmatprep.mubr.msk.f32.mxu1 %vm284_vm2, %v271_v13 }
  0xfc   :  { %1120 = vmatmul.mubr.msk.f32.gmra.mrb[22].mxu1 %vm284_vm2, %v272_v14 }
 0x1b3   :  { %v1100_v16 = vpop.f32.mrb[8].mxu1 }
 0x1b4   :  { %v405_v17 = vadd.f32 %v1100_v16, %v972_v15  ;;  %v399_v18 = vpop.f32.mrb[9].mxu1 }
 0x1b5   :  { %v400_v19 = vadd.f32 %v972_v15, %v399_v18 }
 0x1b6   :  { %v479_v22 = vmax.f32 %v405_v17, 0.0 }
 0x1b7   :  { %v478_v20 = vmax.f32 %v400_v19, 0.0  ;;  %v1103_v21 = vpop.f32.mrb[10].mxu1 }
 0x1b8   :  { %v415_v23 = vadd.f32 %v1103_v21, %v972_v15  ;;  %v409_v24 = vpop.f32.mrb[11].mxu1 }
 0x1b9   :  { %v410_v25 = vadd.f32 %v972_v15, %v409_v24  ;;  %1130 = vmatprep.mubr.msk.f32.mxu0 %vm284_vm2, %v478_v20 }
 0x1ba   :  { %1131 = vmatmul.mubr.msk.f32.vlgmr.msra.gmra.mrb[8].mxu0 %vm284_vm2, %v479_v22  ;;  %v481_v28 = vmax.f32 %v415_v23, 0.0 }
 0x1bb   :  { %v480_v26 = vmax.f32 %v410_v25, 0.0  ;;  %v1106_v27 = vpop.f32.mrb[12].mxu1 }
 0x1bc   :  { %v425_v29 = vadd.f32 %v1106_v27, %v972_v15  ;;  %v419_v30 = vpop.f32.mrb[13].mxu1 }
 0x1bd   :  { %v420_v31 = vadd.f32 %v972_v15, %v419_v30  ;;  %1133 = vmatprep.mubr.msk.f32.mxu0 %vm284_vm2, %v480_v26 }
 0x1be   :  { %v483_v32 = vmax.f32 %v425_v29, 0.0  ;;  %1134 = vmatmul.mubr.msk.f32.gmra.mrb[10].mxu0 %vm284_vm2, %v481_v28 }
 0x1bf   :  { %v482_v33 = vmax.f32 %v420_v31, 0.0  ;;  %v1109_v34 = vpop.f32.mrb[14].mxu1 }
 0x1c0   :  { %v435_v35 = vadd.f32 %v1109_v34, %v972_v15  ;;  %v429_v36 = vpop.f32.mrb[15].mxu1 }
 0x1c1   :  { %v430_v37 = vadd.f32 %v972_v15, %v429_v36  ;;  %1136 = vmatprep.mubr.msk.f32.mxu0 %vm284_vm2, %v482_v33 }
 0x1c2   :  { %v485_v38 = vmax.f32 %v435_v35, 0.0  ;;  %1137 = vmatmul.mubr.msk.f32.gmra.mrb[12].mxu0 %vm284_vm2, %v483_v32 }
 0x1c3   :  { %v484_v39 = vmax.f32 %v430_v37, 0.0  ;;  %v1112_v40 = vpop.f32.mrb[16].mxu1 }
 0x1c4   :  { %v445_v41 = vadd.f32 %v1112_v40, %v972_v15  ;;  %v439_v42 = vpop.f32.mrb[17].mxu1 }
 0x1c5   :  { %1139 = vmatprep.mubr.msk.f32.mxu0 %vm284_vm2, %v484_v39  ;;  %v440_v43 = vadd.f32 %v972_v15, %v439_v42 }
 0x1c6   :  { %1140 = vmatmul.mubr.msk.f32.gmra.mrb[14].mxu0 %vm284_vm2, %v485_v38  ;;  %v487_v44 = vmax.f32 %v445_v41, 0.0 }
 0x1c7   :  { %v486_v45 = vmax.f32 %v440_v43, 0.0  ;;  %v1115_v46 = vpop.f32.mrb[18].mxu1 }
 0x1c8   :  { %v455_v47 = vadd.f32 %v1115_v46, %v972_v15  ;;  %v449_v48 = vpop.f32.mrb[19].mxu1 }
 0x1c9   :  { %1142 = vmatprep.mubr.msk.f32.mxu0 %vm284_vm2, %v486_v45  ;;  %v450_v49 = vadd.f32 %v972_v15, %v449_v48 }
 0x1ca   :  { %v489_v50 = vmax.f32 %v455_v47, 0.0  ;;  %1143 = vmatmul.mubr.msk.f32.gmra.mrb[16].mxu0 %vm284_vm2, %v487_v44 }
 0x1cb   :  { %v488_v51 = vmax.f32 %v450_v49, 0.0  ;;  %v1118_v52 = vpop.f32.mrb[20].mxu1 }
 0x1cc   :  { %v465_v53 = vadd.f32 %v1118_v52, %v972_v15  ;;  %v459_v54 = vpop.f32.mrb[21].mxu1 }
 0x1cd   :  { %v460_v55 = vadd.f32 %v972_v15, %v459_v54  ;;  %1145 = vmatprep.mubr.msk.f32.mxu0 %vm284_vm2, %v488_v51 }
 0x1ce   :  { %v491_v56 = vmax.f32 %v465_v53, 0.0  ;;  %1146 = vmatmul.mubr.msk.f32.gmra.mrb[18].mxu0 %vm284_vm2, %v489_v50 }
 0x1cf   :  { %v490_v57 = vmax.f32 %v460_v55, 0.0  ;;  %v1121_v58 = vpop.f32.mrb[22].mxu1 }
 0x1d0   :  { %v475_v59 = vadd.f32 %v1121_v58, %v972_v15  ;;  %v469_v60 = vpop.f32.mrb[23].mxu1 }
 0x1d1   :  { %1148 = vmatprep.mubr.msk.f32.mxu0 %vm284_vm2, %v490_v57  ;;  %v470_v61 = vadd.f32 %v972_v15, %v469_v60 }
 0x1d2   :  { %v493_v62 = vmax.f32 %v475_v59, 0.0  ;;  %1149 = vmatmul.mubr.msk.f32.gmra.mrb[20].mxu0 %vm284_vm2, %v491_v56 }
 0x1d3   :  { %v492_v63 = vmax.f32 %v470_v61, 0.0 }
 0x1d5   :  { %1151 = vmatprep.mubr.msk.f32.mxu0 %vm284_vm2, %v492_v63 }
 0x1d6   :  { %1152 = vmatmul.mubr.msk.f32.gmra.mrb[22].mxu0 %vm284_vm2, %v493_v62 }
 0x28d   :  { %v1132_v2 = vpop.f32.mrb[8].mxu0 }
 0x28e   :  { %v625_v3 = vadd.f32 %v1132_v2, %v1387_v1  ;;  %v619_v4 = vpop.f32.mrb[9].mxu0 }
 0x28f   :  { %v620_v5 = vadd.f32 %v1387_v1, %v619_v4 }
 0x290   :  { %v699_v7 = vmax.f32 %v625_v3, 0.0 }
 0x291   :  { %v698_v8 = vmax.f32 %v620_v5, 0.0  ;;  %v1135_v9 = vpop.f32.mrb[10].mxu0 }
 0x292   :  { %v635_v10 = vadd.f32 %v1135_v9, %v1387_v1  ;;  %v629_v11 = vpop.f32.mrb[11].mxu0  ;;  %v723_v12 = vmul.f32 %v1394_v6, %v699_v7  ;;  %v715_v7 = vld [vmem:[#allocation2] sm:$0x1] }
 0x293   :  { %v630_v13 = vadd.f32 %v1387_v1, %v629_v11  ;;  %v722_v16 = vmul.f32 %v1394_v6, %v698_v8 }
 0x294   :  { %v701_v14 = vmax.f32 %v635_v10, 0.0  ;;  %v741_v15 = vsel %vm284_vm2, %v723_v12, 0.0 }
 0x295   :  { %v700_v17 = vmax.f32 %v630_v13, 0.0  ;;  %742 = vadd.xlane.f32.xlu0 %v741_v15  ;;  %v1138_v18 = vpop.f32.mrb[12].mxu0  ;;  %v738_v25 = vsel %vm284_vm2, %v722_v16, 0.0 }
 0x296   :  { %v645_v19 = vadd.f32 %v1138_v18, %v1387_v1  ;;  %v639_v20 = vpop.f32.mrb[13].mxu0  ;;  %v725_v21 = vmul.f32 %v1394_v6, %v701_v14 }
 0x297   :  { %v640_v22 = vadd.f32 %v1387_v1, %v639_v20  ;;  %v724_v26 = vmul.f32 %v1394_v6, %v700_v17 }
 0x298   :  { %v703_v23 = vmax.f32 %v645_v19, 0.0  ;;  %v747_v24 = vsel %vm284_vm2, %v725_v21, 0.0 }
 0x299   :  { %v702_v27 = vmax.f32 %v640_v22, 0.0  ;;  %748 = vadd.xlane.f32.xlu1 %v747_v24  ;;  %739 = vadd.xlane.f32.xlu0 %v738_v25  ;;  %v1141_v28 = vpop.f32.mrb[14].mxu0  ;;  %v744_v34 = vsel %vm284_vm2, %v724_v26, 0.0 }
 0x29a   :  { %v655_v29 = vadd.f32 %v1141_v28, %v1387_v1  ;;  %v649_v30 = vpop.f32.mrb[15].mxu0  ;;  %v727_v35 = vmul.f32 %v1394_v6, %v703_v23 }
 0x29b   :  { %v650_v31 = vadd.f32 %v1387_v1, %v649_v30  ;;  %v726_v32 = vmul.f32 %v1394_v6, %v702_v27  ;;  %v791_v27 = vlaneseq }
 0x29c   :  { %v705_v33 = vmax.f32 %v655_v29, 0.0  ;;  %v753_v44 = vsel %vm284_vm2, %v727_v35, 0.0 }
 0x29d   :  { %745 = vadd.xlane.f32.xlu1 %v744_v34  ;;  %v704_v36 = vmax.f32 %v650_v31, 0.0  ;;  %v750_v37 = vsel %vm284_vm2, %v726_v32, 0.0  ;;  %v1144_v38 = vpop.f32.mrb[16].mxu0  ;;  %v1442_v30 = vshrl.u32 %v791_v27, 7  ;;  %v1445_v31 = vand.u32 127, %v791_v27 }
 0x29e   :  { %751 = vadd.xlane.f32.xlu0 %v750_v37  ;;  %v665_v39 = vadd.f32 %v1144_v38, %v1387_v1  ;;  %v729_v40 = vmul.f32 %v1394_v6, %v705_v33  ;;  %v659_v41 = vpop.f32.mrb[17].mxu0 }
 0x29f   :  { %v660_v42 = vadd.f32 %v1387_v1, %v659_v41  ;;  %v728_v43 = vmul.f32 %v1394_v6, %v704_v36  ;;  %v833_v35 = vadd.s32 4294967288, %v1445_v31  ;;  %v840_v36 = vadd.s32 4294967280, %v1445_v31 }
 0x2a0   :  { %v707_v45 = vmax.f32 %v665_v39, 0.0  ;;  %v759_v46 = vsel %vm284_vm2, %v729_v40, 0.0  ;;  %v831_v40 = vsub.s32 %v1445_v31, %v1442_v30  ;;  %v917_v27 = vadd.s32 4294967192, %v1445_v31 }
 0x2a1   :  { %754 = vadd.xlane.f32.xlu1 %v753_v44  ;;  %v1147_v47 = vpop.f32.mrb[18].mxu0  ;;  %v706_v50 = vmax.f32 %v660_v42, 0.0  ;;  %v756_v51 = vsel %vm284_vm2, %v728_v43, 0.0  ;;  %v836_v41 = vsub.s32 %v833_v35, %v1442_v30  ;;  %v843_v43 = vsub.s32 %v840_v36, %v1442_v30 }
 0x2a2   :  { %760 = vadd.xlane.f32.xlu0 %v759_v46  ;;  %v675_v48 = vadd.f32 %v1147_v47, %v1387_v1  ;;  %v669_v49 = vpop.f32.mrb[19].mxu0  ;;  %v731_v53 = vmul.f32 %v1394_v6, %v707_v45  ;;  %v847_v46 = vadd.s32 4294967272, %v1445_v31 }
 0x2a3   :  { %v670_v52 = vadd.f32 %v1387_v1, %v669_v49  ;;  %v730_v61 = vmul.f32 %v1394_v6, %v706_v50  ;;  %v854_v49 = vadd.s32 4294967264, %v1445_v31 }
 0x2a4   :  { %v709_v54 = vmax.f32 %v675_v48, 0.0  ;;  %v765_v59 = vsel %vm284_vm2, %v731_v53, 0.0  ;;  %v861_v53 = vadd.s32 4294967256, %v1445_v31 }
 0x2a5   :  { %v1150_v55 = vpop.f32.mrb[20].mxu0  ;;  %v708_v58 = vmax.f32 %v670_v52, 0.0  ;;  %v762_v2 = vsel %vm284_vm2, %v730_v61, 0.0  ;;  %v850_v52 = vsub.s32 %v847_v46, %v1442_v30 }
 0x2a6   :  { %757 = vadd.xlane.f32.xlu0 %v756_v51  ;;  %v679_v56 = vpop.f32.mrb[21].mxu0  ;;  %v733_v57 = vmul.f32 %v1394_v6, %v709_v54  ;;  %v685_v60 = vadd.f32 %v1150_v55, %v1387_v1 }
 0x2a7   :  { %v680_v3 = vadd.f32 %v1387_v1, %v679_v56  ;;  %v732_v4 = vmul.f32 %v1394_v6, %v708_v58  ;;  %v857_v56 = vsub.s32 %v854_v49, %v1442_v30 }
 0x2a8   :  { %v711_v0 = vmax.f32 %v685_v60, 0.0 }
 0x2a9   :  { %v1153_v62 = vpop.f32.mrb[22].mxu0  ;;  %v710_v5 = vmax.f32 %v680_v3, 0.0  ;;  %v768_v8 = vsel %vm284_vm2, %v732_v4, 0.0 }
 0x2aa   :  { %766 = vadd.xlane.f32.xlu0 %v765_v59  ;;  %v689_v63 = vpop.f32.mrb[23].mxu0  ;;  %v735_v10 = vmul.f32 %v1394_v6, %v711_v0  ;;  %v695_v11 = vadd.f32 %v1153_v62, %v1387_v1  ;;  %v868_v59 = vadd.s32 4294967248, %v1445_v31  ;;  %v864_v62 = vsub.s32 %v861_v53, %v1442_v30 }
 0x2ab   :  { %v690_v9 = vadd.f32 %v1387_v1, %v689_v63  ;;  %v734_v14 = vmul.f32 %v1394_v6, %v710_v5  ;;  %v771_v1 = vsel %vm284_vm2, %v733_v57, 0.0  ;;  %v882_v5 = vadd.s32 4294967232, %v1445_v31 }
 0x2ac   :  { %v777_v13 = vsel %vm284_vm2, %v735_v10, 0.0  ;;  %v713_v15 = vmax.f32 %v695_v11, 0.0  ;;  %v871_v0 = vsub.s32 %v868_v59, %v1442_v30 }
 0x2ad   :  { %v712_v12 = vmax.f32 %v690_v9, 0.0  ;;  %v774_v16 = vsel %vm284_vm2, %v734_v14, 0.0  ;;  %v889_v9 = vadd.s32 4294967224, %v1445_v31  ;;  %v885_v14 = vsub.s32 %v882_v5, %v1442_v30 }
 0x2ae   :  { %763 = vadd.xlane.f32.xlu0 %v762_v2  ;;  %v737_v19 = vmul.f32 %v1394_v6, %v713_v15  ;;  %v875_v2 = vadd.s32 4294967240, %v1445_v31 }
 0x2af   :  { %v736_v17 = vmul.f32 %v1394_v6, %v712_v12  ;;  %v793_v6 = vsub.s32 0, %v1442_v30 }
 0x2b0   :  { %v783_v20 = vsel %vm284_vm2, %v737_v19, 0.0  ;;  %v878_v12 = vsub.s32 %v875_v2, %v1442_v30  ;;  %v892_v19 = vsub.s32 %v889_v9, %v1442_v30 }
 0x2b1   :  { %v780_v18 = vsel %vm284_vm2, %v736_v17, 0.0 }
 0x2b2   :  { %788 = vperm.xlu1 %1174, %v715_v7   ;;  %769 = vadd.xlane.f32.xlu0 %v768_v8 }
 0x2b6   :  { %778 = vadd.xlane.f32.xlu0 %v777_v13 }
 0x2ba   :  { %775 = vadd.xlane.f32.xlu0 %v774_v16  ;;  %v896_v16 = vadd.s32 4294967216, %v1445_v31 }
 0x2be   :  { %781 = vadd.xlane.f32.xlu0 %v780_v18 }
 0x2c2   :  { %784 = vadd.xlane.f32.xlu0 %v783_v20 }
 0x2d6   :  { %772 = vadd.xlane.f32.xlu1 %v771_v1  ;;  %v903_v1 = vadd.s32 4294967208, %v1445_v31 }
 0x322   :  { %v743_v21 = vpop.xlane.xlu0 %742 }
 0x326   :  { %v740_v22 = vpop.xlane.xlu0 %739  ;;  %v749_v23 = vpop.xlane.xlu1 %748 }
 0x32a   :  { %v746_v25 = vpop.xlane.xlu1 %745 }
 0x32b   :  { %v752_v24 = vpop.xlane.xlu0 %751 }
 0x32e   :  { %v755_v28 = vpop.xlane.xlu1 %754 }
 0x32f   :  { %v761_v26 = vpop.xlane.xlu0 %760 }
 0x332   :  { %v789_v32 = vpop.permute.xlu1 %788 }
 0x333   :  { %v758_v29 = vpop.xlane.xlu0 %757  ;;  %v1447_v34 = vrot.slane %v789_v32, %v793_v6  ;;  %v906_v6 = vsub.s32 %v903_v1, %v1442_v30 }
 0x335   :  { %v795_v38 = vadd.f32 %v1447_v34, %v740_v22  ;;  %v796_v39 = vadd.f32 %v1447_v34, %v743_v21  ;;  %v797_v42 = vadd.f32 %v1447_v34, %v746_v25  ;;  %v798_v50 = vadd.f32 %v1447_v34, %v749_v23 }
 0x336   :  { %v799_v54 = vadd.f32 %v1447_v34, %v752_v24  ;;  %v800_v60 = vadd.f32 %v1447_v34, %v755_v28  ;;  %v801_v4 = vadd.f32 %v1447_v34, %v758_v29  ;;  %v802_v11 = vadd.f32 %v1447_v34, %v761_v26 }
 0x337   :  { %v767_v33 = vpop.xlane.xlu0 %766  ;;  %v832_v44 = vrot.slane %v795_v38, %v831_v40  ;;  %v837_v45 = vrot.slane %v796_v39, %v836_v41  ;;  %v844_v48 = vrot.slane %v797_v42, %v843_v43  ;;  %v851_v58 = vrot.slane %v798_v50, %v850_v52 }
 0x338   :  { %v858_v63 = vrot.slane %v799_v54, %v857_v56  ;;  %v865_v8 = vrot.slane %v800_v60, %v864_v62  ;;  %v872_v13 = vrot.slane %v801_v4, %v871_v0  ;;  %v879_v20 = vrot.slane %v802_v11, %v878_v12 }
 0x339   :  { %v839_v51 = vsel %vm838_vm3, %v837_v45, %v832_v44  ;;  %v899_v22 = vsub.s32 %v896_v16, %v1442_v30  ;;  %v910_v24 = vadd.s32 4294967200, %v1445_v31  ;;  %v804_v25 = vadd.f32 %v1447_v34, %v767_v33 }
 0x33a   :  { %v846_v55 = vsel %vm845_vm4, %v844_v48, %v839_v51  ;;  %v924_v28 = vadd.s32 4294967184, %v1445_v31  ;;  %v931_v29 = vadd.s32 4294967176, %v1445_v31  ;;  %v920_v40 = vsub.s32 %v917_v27, %v1442_v30 }
 0x33b   :  { %v764_v37 = vpop.xlane.xlu0 %763  ;;  %v853_v61 = vsel %vm852_vm5, %v851_v58, %v846_v55  ;;  %v913_v36 = vsub.s32 %v910_v24, %v1442_v30  ;;  %v893_v39 = vrot.slane %v804_v25, %v892_v19 }
 0x33c   :  { %v860_v3 = vsel %vm859_vm6, %v858_v63, %v853_v61  ;;  %v803_v15 = vadd.f32 %v1447_v34, %v764_v37  ;;  %v927_v31 = vsub.s32 %v924_v28, %v1442_v30  ;;  %v934_v44 = vsub.s32 %v931_v29, %v1442_v30 }
 0x33d   :  { %v867_v10 = vsel %vm866_vm7, %v865_v8, %v860_v3 }
 0x33e   :  { %v874_v17 = vsel %vm873_vm8, %v872_v13, %v867_v10  ;;  %v886_v21 = vrot.slane %v803_v15, %v885_v14 }
 0x33f   :  { %v770_v47 = vpop.xlane.xlu0 %769  ;;  %v881_v26 = vsel %vm880_vm9, %v879_v20, %v874_v17 }
 0x340   :  { %v805_v23 = vadd.f32 %v1447_v34, %v770_v47  ;;  %v888_v32 = vsel %vm887_vm10, %v886_v21, %v881_v26 }
 0x341   :  { %v895_v45 = vsel %vm894_vm11, %v893_v39, %v888_v32 }
 0x342   :  { %v900_v35 = vrot.slane %v805_v23, %v899_v22 }
 0x343   :  { %v779_v57 = vpop.xlane.xlu0 %778 }
 0x344   :  { %v808_v41 = vadd.f32 %v1447_v34, %v779_v57  ;;  %v902_v48 = vsel %vm901_vm12, %v900_v35, %v895_v45 }
 0x346   :  { %v921_v50 = vrot.slane %v808_v41, %v920_v40 }
 0x347   :  { %v776_v7 = vpop.xlane.xlu0 %775 }
 0x348   :  { %v807_v37 = vadd.f32 %v1447_v34, %v776_v7 }
 0x34a   :  { %v914_v49 = vrot.slane %v807_v37, %v913_v36 }
 0x34b   :  { %v782_v18 = vpop.xlane.xlu0 %781 }
 0x34c   :  { %v809_v43 = vadd.f32 %v1447_v34, %v782_v18 }
 0x34e   :  { %v928_v52 = vrot.slane %v809_v43, %v927_v31 }
 0x34f   :  { %v785_v38 = vpop.xlane.xlu0 %784 }
 0x350   :  { %v810_v46 = vadd.f32 %v1447_v34, %v785_v38 }
 0x352   :  { %v935_v30 = vrot.slane %v810_v46, %v934_v44 }
 0x363   :  { %v773_v33 = vpop.xlane.xlu1 %772 }
 0x364   :  { %v806_v42 = vadd.f32 %v1447_v34, %v773_v33 }
 0x366   :  { %v907_v47 = vrot.slane %v806_v42, %v906_v6 }
 0x368   :  { %v909_v51 = vsel %vm908_vm13, %v907_v47, %v902_v48 }
 0x369   :  { %v916_v53 = vsel %vm915_vm14, %v914_v49, %v909_v51 }
 0x36a   :  { %v923_v54 = vsel %vm922_vm15, %v921_v50, %v916_v53 }
 0x36b   :  { %v930_v55 = vsel %vm929_vm0, %v928_v52, %v923_v54 }
 0x36c   :  { %v937_v56 = vsel %vm936_vm1, %v935_v30, %v930_v55 }
 0x36d   :  { %939 = vst [vmem:[#allocation3] sm:$0x1] %v937_v56 }
 0x36e   :  { %1187 = shalt.err (!%p1184_p4)
}
 0x36f   :  { %s1188_s3 = scalar_lea.hbm %s1520_s9, 16 }
 0x370   :  { %p1189_p5 = scmp.ne.s32.totalorder %s1520_s9, %s1188_s3  ;;  %p1192_p6 = scmp.lt.u32.totalorder %s1188_s3, %s1520_s9 }
 0x372   :  { %p1194_p7 = pnand %p1192_p6, %p1189_p5 }
 0x374   :  { %1197 = shalt.err (!%p1194_p7)
}
 0x375   :  { %949 = dma.vmem_to_hbm [thread:$0]  %s947_s7, 16, %s1520_s9, [#allocation4]  }
 0x376   :  { %1198 = dma.done.wait [#allocation4], 16  }
 0x377   :  { %1199 = vsyncadd [#allocation4], 4294967280 }
 0x378   :  { %953 = vsyncpa [#allocation4], 1 }

</bundles_post_ra>
